<compile_context>
chip_gen: v7x
topology: tpu7x:2x2x1
jax: 0.10.0
libtpu: 0.0.40
codegen_flags: <defaults>
</compile_context>

<pallas_src>
import functools

import jax
import jax.numpy as jnp
from jax import lax
from jax.experimental import pallas as pl
from jax.experimental.pallas import tpu as pltpu

EPS = 1e-6
HIDDEN = 128
A_SUB = 8           # output head padded to 8 rows (sublane-aligned)
TM_DEFAULT = 1024   # row tile for large batches (sweepable: 512/1024/2048)


def _actor_kernel(apply_out_tanh,
                  x_ref, w1_ref, b1_ref, g1_ref, be1_ref,
                  w2_ref, b2_ref, w3t_ref, b3t_ref, o_ref):
    x = x_ref[...].astype(jnp.float32)

    # ---- Linear 1: (tm, S) @ (S, 128) + (1, 128) ----
    h = jnp.dot(x, w1_ref[...], preferred_element_type=jnp.float32) + b1_ref[...]

    # ---- LayerNorm 1 (custom torch LayerNorm: unbiased std, eps added to std) ----
    n = h.shape[-1]
    mean = jnp.mean(h, axis=-1, keepdims=True)
    centered = h - mean
    var_unbiased = jnp.sum(centered * centered, axis=-1, keepdims=True) * (1.0 / (n - 1))
    std = jnp.sqrt(var_unbiased)
    inv = pl.reciprocal(std + EPS, approx=False)  # exact; keeps tight parity
    h = g1_ref[...] * centered * inv + be1_ref[...]

    h = jnp.tanh(h)

    # ---- Linear 2: (tm, 128) @ (128, 128) + (1, 128) ----
    h = jnp.dot(h, w2_ref[...], preferred_element_type=jnp.float32) + b2_ref[...]

    # lnorm2 output is discarded in the reference forward -> intentionally skipped.

    h = jnp.tanh(h)

    # ---- Output head, computed transposed: (A_SUB, tm) = W_out (A_SUB,H) . h^T ----
    # Keeps the stored tile lane-dense (batch on lanes) so HBM writeback is
    # 8 sublanes * tm lanes instead of tm rows of a 128-lane padded head.
    out_t = lax.dot_general(
        w3t_ref[...], h,
        dimension_numbers=(((1,), (1,)), ((), ())),
        preferred_element_type=jnp.float32) + b3t_ref[...]

    if apply_out_tanh:
        out_t = jnp.tanh(out_t)

    o_ref[...] = out_t.astype(o_ref.dtype)


def actor_forward(x, params, out_act="tanh", block_rows=TM_DEFAULT):
    """x: (N, state_dim) f32 — N may be any number of stacked states/actors."""
    N, S = x.shape
    action_dim = params["action_dim"]
    hidden = params["w_l1"].shape[1]
    a_sub = params["w_out_t"].shape[0]     # 8 (sublane-padded output head)

    if N <= block_rows:
        # Single block covering the whole batch: block dims equal the full
        # array dims, so no alignment padding is ever needed.
        tm = N
        grid = (1,)
    else:
        tm = block_rows
        assert tm % 128 == 0, "multi-step grid needs a 128-aligned row tile"
        grid = (pl.cdiv(N, tm),)
    # No wrapper-side padding of x: the ragged last block reads unspecified
    # rows whose results land in output lanes beyond N and are masked off.

    # x streams per grid step (batch on sublanes); output streams per step
    # (batch on lanes); all params have constant index_maps -> resident in VMEM.
    x_spec = pl.BlockSpec((tm, S), lambda i: (i, 0))
    out_spec = pl.BlockSpec((a_sub, tm), lambda i: (0, i))

    def resident(arr):
        return pl.BlockSpec(arr.shape, lambda i: (0, 0))

    operands = (
        x,
        params["w_l1"], params["b_l1"],
        params["gamma1"], params["beta1"],
        params["w_l2"], params["b_l2"],
        params["w_out_t"], params["b_out_t"],
    )
    in_specs = [x_spec] + [resident(a) for a in operands[1:]]

    # Advisory cost estimate so XLA schedules around this small call sanely.
    param_bytes = 4 * sum(int(p.size) for k, p in params.items()
                          if k != "action_dim")
    flops = 2 * N * (S * hidden + hidden * hidden + hidden * a_sub)
    transcendentals = N * (2 * hidden + (a_sub if out_act == "tanh" else 0))
    bytes_accessed = param_bytes + 4 * (N * S + a_sub * N)

    kernel = functools.partial(_actor_kernel, out_act == "tanh")

    out_t = pl.pallas_call(
        kernel,
        out_shape=jax.ShapeDtypeStruct((a_sub, N), jnp.float32),
        grid=grid,
        in_specs=in_specs,
        out_specs=out_spec,
        compiler_params=pltpu.CompilerParams(
            dimension_semantics=("parallel",)),
        cost_estimate=pl.CostEstimate(
            flops=flops,
            transcendentals=transcendentals,
            bytes_accessed=bytes_accessed),
    )(*operands)

    # (a_sub, N) -> (N, action_dim): tiny slice + transpose in the wrapper.
    return out_t[:action_dim, :].T


def init_actor_params(key, state_dim, action_dim, is_evo=False, hidden=HIDDEN):
    """Deterministic synthetic init matching the module's parameter shapes.

    PyTorch Linear stores W as (out, in). Hidden layers are pre-transposed to
    (in, out) so the kernel does x @ W; the output head is kept in (out, in)
    orientation and zero-padded to 8 rows so the kernel can emit a compact
    lane-dense (8, batch) tile. Biases / gamma / beta are (1, F); the output
    bias is (8, 1).
    """
    k1, k2, k3, k4, k5, k6 = jax.random.split(key, 6)

    def lin(kw, kb, fan_in, fan_out):
        bound = 1.0 / jnp.sqrt(fan_in)
        w = jax.random.uniform(kw, (fan_in, fan_out), jnp.float32, -bound, bound)
        b = jax.random.uniform(kb, (1, fan_out), jnp.float32, -bound, bound)
        return w, b

    w1, b1 = lin(k1, k2, state_dim, hidden)
    w2, b2 = lin(k3, k4, hidden, hidden)
    w3, b3 = lin(k5, k6, hidden, action_dim)

    if not is_evo:
        w3 = w3 * 0.1
        b3 = b3 * 0.1

    w3t = jnp.zeros((A_SUB, hidden), jnp.float32).at[:action_dim, :].set(w3.T)
    b3t = jnp.zeros((A_SUB, 1), jnp.float32).at[:action_dim, 0].set(b3[0])

    return {
        "w_l1": w1, "b_l1": b1,
        "gamma1": jnp.ones((1, hidden), jnp.float32),
        "beta1": jnp.zeros((1, hidden), jnp.float32),
        # lnorm2 params exist in the module but its output is discarded in forward.
        "w_l2": w2, "b_l2": b2,
        "w_out_t": w3t, "b_out_t": b3t,
        "action_dim": action_dim,
    }


def _reference_forward(x, params, out_act="tanh"):
    """Pure-JAX reference mirroring the PyTorch forward (for sanity check)."""
    ad = params["action_dim"]
    w_out = params["w_out_t"][:ad, :].T          # (H, ad)
    b_out = params["b_out_t"][:ad, 0]            # (ad,)
    h = x @ params["w_l1"] + params["b_l1"]
    n = h.shape[-1]
    mean = jnp.mean(h, axis=-1, keepdims=True)
    std = jnp.sqrt(jnp.sum((h - mean) ** 2, axis=-1, keepdims=True) / (n - 1))
    h = params["gamma1"] * (h - mean) / (std + EPS) + params["beta1"]
    h = jnp.tanh(h)
    h = h @ params["w_l2"] + params["b_l2"]
    h = jnp.tanh(h)
    out = h @ w_out + b_out
    if out_act == "tanh":
        out = jnp.tanh(out)
    return out


if __name__ == "__main__":
    key = jax.random.PRNGKey(0)
    k_params, k_x1, k_x2 = jax.random.split(key, 3)

    state_dim = 16
    action_dim = 4
    params = init_actor_params(k_params, state_dim, action_dim, is_evo=False)

    # Small single-block case (grid of 1, full-array blocks, no padding).
    batch = 8
    x = jax.random.normal(k_x1, (batch, state_dim), jnp.float32)
    out = jax.block_until_ready(actor_forward(x, params, out_act="tanh"))
    ref = _reference_forward(x, params, out_act="tanh")
    assert out.shape == (batch, action_dim)
    assert jnp.allclose(out, ref, atol=2e-5, rtol=2e-5)

    # Multi-step grid with a ragged tail: small block_rows just to exercise the
    # streaming + boundary-masking path at small shapes (default tile is 1024).
    big = 300
    xb = jax.random.normal(k_x2, (big, state_dim), jnp.float32)
    outb = jax.block_until_ready(
        actor_forward(xb, params, out_act="tanh", block_rows=128))
    refb = _reference_forward(xb, params, out_act="tanh")
    assert outb.shape == (big, action_dim)
    assert jnp.allclose(outb, refb, atol=2e-5, rtol=2e-5)

    # Non-tanh output head path.
    outl = jax.block_until_ready(actor_forward(x, params, out_act="linear"))
    refl = _reference_forward(x, params, out_act="linear")
    assert jnp.allclose(outl, refl, atol=2e-5, rtol=2e-5)

    print("KERNEL_OK")
</pallas_src>

<mosaic_0001>
module attributes {stable_mosaic.version = 11 : i64} {
  func.func @_actor_kernel(%arg0: i32, %arg1: memref<8x16xf32, #tpu.memory_space<vmem>>, %arg2: memref<16x128xf32, #tpu.memory_space<vmem>>, %arg3: memref<1x128xf32, #tpu.memory_space<vmem>>, %arg4: memref<1x128xf32, #tpu.memory_space<vmem>>, %arg5: memref<1x128xf32, #tpu.memory_space<vmem>>, %arg6: memref<128x128xf32, #tpu.memory_space<vmem>>, %arg7: memref<1x128xf32, #tpu.memory_space<vmem>>, %arg8: memref<8x128xf32, #tpu.memory_space<vmem>>, %arg9: memref<8x1xf32, #tpu.memory_space<vmem>>, %arg10: memref<8x8xf32, #tpu.memory_space<vmem>>) attributes {dimension_semantics = [#tpu.dimension_semantics<parallel>], iteration_bounds = array<i64: 1>, scalar_prefetch = 0 : i64, scratch_operands = 0 : i64, tpu.core_type = #tpu.core_type<tc>, window_params = [{transform_indices = @transform_0, window_bounds = array<i64: 8, 16>}, {pipeline_mode = #tpu.pipeline_mode<synchronous>, transform_indices = @transform_1, window_bounds = array<i64: 16, 128>}, {pipeline_mode = #tpu.pipeline_mode<synchronous>, transform_indices = @transform_2, window_bounds = array<i64: 1, 128>}, {pipeline_mode = #tpu.pipeline_mode<synchronous>, transform_indices = @transform_3, window_bounds = array<i64: 1, 128>}, {pipeline_mode = #tpu.pipeline_mode<synchronous>, transform_indices = @transform_4, window_bounds = array<i64: 1, 128>}, {pipeline_mode = #tpu.pipeline_mode<synchronous>, transform_indices = @transform_5, window_bounds = array<i64: 128, 128>}, {pipeline_mode = #tpu.pipeline_mode<synchronous>, transform_indices = @transform_6, window_bounds = array<i64: 1, 128>}, {pipeline_mode = #tpu.pipeline_mode<synchronous>, transform_indices = @transform_7, window_bounds = array<i64: 8, 128>}, {pipeline_mode = #tpu.pipeline_mode<synchronous>, transform_indices = @transform_8, window_bounds = array<i64: 8, 1>}, {transform_indices = @transform_9, window_bounds = array<i64: 8, 8>}]} {
    %c0 = arith.constant 0 : index
    %c0_0 = arith.constant 0 : index
    %0 = vector.load %arg1[%c0, %c0_0] : memref<8x16xf32, #tpu.memory_space<vmem>>, vector<8x16xf32>
    %c0_1 = arith.constant 0 : index
    %c0_2 = arith.constant 0 : index
    %1 = vector.load %arg2[%c0_1, %c0_2] : memref<16x128xf32, #tpu.memory_space<vmem>>, vector<16x128xf32>
    %cst = arith.constant dense<0.000000e+00> : vector<8x128xf32>
    %2 = tpu.matmul %0, %1, %cst {dimension_numbers = #tpu.dot_dimension_numbers<[1], [0], [0], [1], [0, 0, 1, 1], [], []>} : vector<8x16xf32>, vector<16x128xf32>, vector<8x128xf32> -> vector<8x128xf32>
    %c0_3 = arith.constant 0 : index
    %c0_4 = arith.constant 0 : index
    %3 = vector.load %arg3[%c0_3, %c0_4] : memref<1x128xf32, #tpu.memory_space<vmem>>, vector<1x128xf32>
    %4 = vector.broadcast %3 : vector<1x128xf32> to vector<8x128xf32>
    %5 = arith.addf %2, %4 : vector<8x128xf32>
    %cst_5 = arith.constant dense<0.000000e+00> : vector<8xf32>
    %6 = vector.multi_reduction <add>, %5, %cst_5 [1] : vector<8x128xf32> to vector<8xf32>
    %7 = vector.shape_cast %6 : vector<8xf32> to vector<8x1xf32>
    %cst_6 = arith.constant 1.280000e+02 : f32
    %8 = vector.broadcast %cst_6 : f32 to vector<8x1xf32>
    %9 = arith.divf %7, %8 : vector<8x1xf32>
    %10 = vector.broadcast %9 : vector<8x1xf32> to vector<8x128xf32>
    %11 = arith.subf %5, %10 : vector<8x128xf32>
    %12 = arith.mulf %11, %11 : vector<8x128xf32>
    %cst_7 = arith.constant dense<0.000000e+00> : vector<8xf32>
    %13 = vector.multi_reduction <add>, %12, %cst_7 [1] : vector<8x128xf32> to vector<8xf32>
    %14 = vector.shape_cast %13 : vector<8xf32> to vector<8x1xf32>
    %cst_8 = arith.constant 0.00787401571 : f32
    %15 = vector.broadcast %cst_8 : f32 to vector<8x1xf32>
    %16 = arith.mulf %14, %15 : vector<8x1xf32>
    %17 = math.sqrt %16 : vector<8x1xf32>
    %cst_9 = arith.constant 9.99999997E-7 : f32
    %18 = vector.broadcast %cst_9 : f32 to vector<8x1xf32>
    %19 = arith.addf %17, %18 : vector<8x1xf32>
    %20 = tpu.reciprocal %19 : vector<8x1xf32> -> vector<8x1xf32>
    %c0_10 = arith.constant 0 : index
    %c0_11 = arith.constant 0 : index
    %21 = vector.load %arg4[%c0_10, %c0_11] : memref<1x128xf32, #tpu.memory_space<vmem>>, vector<1x128xf32>
    %22 = vector.broadcast %21 : vector<1x128xf32> to vector<8x128xf32>
    %23 = arith.mulf %22, %11 : vector<8x128xf32>
    %24 = vector.broadcast %20 : vector<8x1xf32> to vector<8x128xf32>
    %25 = arith.mulf %23, %24 : vector<8x128xf32>
    %c0_12 = arith.constant 0 : index
    %c0_13 = arith.constant 0 : index
    %26 = vector.load %arg5[%c0_12, %c0_13] : memref<1x128xf32, #tpu.memory_space<vmem>>, vector<1x128xf32>
    %27 = vector.broadcast %26 : vector<1x128xf32> to vector<8x128xf32>
    %28 = arith.addf %25, %27 : vector<8x128xf32>
    %29 = math.tanh %28 : vector<8x128xf32>
    %c0_14 = arith.constant 0 : index
    %c0_15 = arith.constant 0 : index
    %30 = vector.load %arg6[%c0_14, %c0_15] : memref<128x128xf32, #tpu.memory_space<vmem>>, vector<128x128xf32>
    %cst_16 = arith.constant dense<0.000000e+00> : vector<8x128xf32>
    %31 = tpu.matmul %29, %30, %cst_16 {dimension_numbers = #tpu.dot_dimension_numbers<[1], [0], [0], [1], [0, 0, 1, 1], [], []>} : vector<8x128xf32>, vector<128x128xf32>, vector<8x128xf32> -> vector<8x128xf32>
    %c0_17 = arith.constant 0 : index
    %c0_18 = arith.constant 0 : index
    %32 = vector.load %arg7[%c0_17, %c0_18] : memref<1x128xf32, #tpu.memory_space<vmem>>, vector<1x128xf32>
    %33 = vector.broadcast %32 : vector<1x128xf32> to vector<8x128xf32>
    %34 = arith.addf %31, %33 : vector<8x128xf32>
    %35 = math.tanh %34 : vector<8x128xf32>
    %c0_19 = arith.constant 0 : index
    %c0_20 = arith.constant 0 : index
    %36 = vector.load %arg8[%c0_19, %c0_20] : memref<8x128xf32, #tpu.memory_space<vmem>>, vector<8x128xf32>
    %cst_21 = arith.constant dense<0.000000e+00> : vector<8x8xf32>
    %37 = tpu.matmul %36, %35, %cst_21 {dimension_numbers = #tpu.dot_dimension_numbers<[1], [1], [0], [0], [0, 0, 1, 0], [], []>} : vector<8x128xf32>, vector<8x128xf32>, vector<8x8xf32> -> vector<8x8xf32>
    %c0_22 = arith.constant 0 : index
    %c0_23 = arith.constant 0 : index
    %38 = vector.load %arg9[%c0_22, %c0_23] : memref<8x1xf32, #tpu.memory_space<vmem>>, vector<8x1xf32>
    %39 = vector.broadcast %38 : vector<8x1xf32> to vector<8x8xf32>
    %40 = arith.addf %37, %39 : vector<8x8xf32>
    %41 = math.tanh %40 : vector<8x8xf32>
    %c0_24 = arith.constant 0 : index
    %c0_25 = arith.constant 0 : index
    %42 = vector.load %arg10[%c0_24, %c0_25] : memref<8x8xf32, #tpu.memory_space<vmem>>, vector<8x8xf32>
    tpu.vector_store %arg10[%c0_24, %c0_25], %41 {strides = array<i32>} : memref<8x8xf32, #tpu.memory_space<vmem>>, vector<8x8xf32>,
    return
  }
  func.func @transform_0(%arg0: i32) -> (i32, i32) {
    %c0_i32 = arith.constant 0 : i32
    %c0_i32_0 = arith.constant 0 : i32
    return %arg0, %c0_i32 : i32, i32
  }
  func.func @transform_1(%arg0: i32) -> (i32, i32) {
    %c0_i32 = arith.constant 0 : i32
    %c0_i32_0 = arith.constant 0 : i32
    %c0_i32_1 = arith.constant 0 : i32
    return %c0_i32, %c0_i32_0 : i32, i32
  }
  func.func @transform_2(%arg0: i32) -> (i32, i32) {
    %c0_i32 = arith.constant 0 : i32
    %c0_i32_0 = arith.constant 0 : i32
    %c0_i32_1 = arith.constant 0 : i32
    return %c0_i32, %c0_i32_0 : i32, i32
  }
  func.func @transform_3(%arg0: i32) -> (i32, i32) {
    %c0_i32 = arith.constant 0 : i32
    %c0_i32_0 = arith.constant 0 : i32
    %c0_i32_1 = arith.constant 0 : i32
    return %c0_i32, %c0_i32_0 : i32, i32
  }
  func.func @transform_4(%arg0: i32) -> (i32, i32) {
    %c0_i32 = arith.constant 0 : i32
    %c0_i32_0 = arith.constant 0 : i32
    %c0_i32_1 = arith.constant 0 : i32
    return %c0_i32, %c0_i32_0 : i32, i32
  }
  func.func @transform_5(%arg0: i32) -> (i32, i32) {
    %c0_i32 = arith.constant 0 : i32
    %c0_i32_0 = arith.constant 0 : i32
    %c0_i32_1 = arith.constant 0 : i32
    return %c0_i32, %c0_i32_0 : i32, i32
  }
  func.func @transform_6(%arg0: i32) -> (i32, i32) {
    %c0_i32 = arith.constant 0 : i32
    %c0_i32_0 = arith.constant 0 : i32
    %c0_i32_1 = arith.constant 0 : i32
    return %c0_i32, %c0_i32_0 : i32, i32
  }
  func.func @transform_7(%arg0: i32) -> (i32, i32) {
    %c0_i32 = arith.constant 0 : i32
    %c0_i32_0 = arith.constant 0 : i32
    %c0_i32_1 = arith.constant 0 : i32
    return %c0_i32, %c0_i32_0 : i32, i32
  }
  func.func @transform_8(%arg0: i32) -> (i32, i32) {
    %c0_i32 = arith.constant 0 : i32
    %c0_i32_0 = arith.constant 0 : i32
    %c0_i32_1 = arith.constant 0 : i32
    return %c0_i32, %c0_i32_0 : i32, i32
  }
  func.func @transform_9(%arg0: i32) -> (i32, i32) {
    %c0_i32 = arith.constant 0 : i32
    %c0_i32_0 = arith.constant 0 : i32
    return %c0_i32, %arg0 : i32, i32
  }
}

</mosaic_0001>

<bundles_post_ra>
// kernel: tpu_custom_call.1
= control target key start
LH: loop header
LB: loop body
LE: loop exit
PB: predicated region body
PF: predicated region fallthrough
CT: control target
= control target key end

     0   :  { %14 = vsyncpa [#allocation3], 0  ;;  %s741_s0 = inlined_call_operand.vmem [shape: f32[8,16], index: 0, kind: input, shape index: {}]   ;;  %s742_s1 = inlined_call_operand.hbm [shape: f32[16,128], index: 1, kind: input, shape index: {}]   ;;  %s743_s2 = inlined_call_operand.hbm [shape: f32[1,128], index: 2, kind: input, shape index: {}]   ;;  %s744_s3 = inlined_call_operand.vmem [shape: f32[1,128], index: 3, kind: input, shape index: {}]   ;;  %s745_s4 = inlined_call_operand.vmem [shape: f32[1,128], index: 4, kind: input, shape index: {}]   ;;  %s746_s5 = inlined_call_operand.hbm [shape: f32[128,128], index: 5, kind: input, shape index: {}]   ;;  %s747_s6 = inlined_call_operand.vmem [shape: f32[1,128], index: 6, kind: input, shape index: {}]   ;;  %s748_s7 = inlined_call_operand.vmem [shape: f32[8,128], index: 7, kind: input, shape index: {}]   ;;  %s749_s8 = inlined_call_operand.vmem [shape: f32[8,1], index: 8, kind: input, shape index: {}]   ;;  %s750_s9 = inlined_call_operand.hbm [shape: f32[8,8], index: 9, kind: output, shape index: {}]  }
   0x1   :  { %15 = vsyncpa [#allocation6], 0 }
   0x2   :  { %16 = vsyncpa [#allocation4], 0  ;;  %s599_s30 = smov [#allocation5]   ;;  %s600_s11 = smov [#allocation2]  }
   0x3   :  { %s37_s10 = sshll.u32 %s599_s30, 4  ;;  %s24_s12 = sshll.u32 %s600_s11, 4  ;;  %s38_s10 = int_to_ptr.vmem [resolvable:$true] %s37_s10  ;;  %s659_s12 = int_to_ptr.vmem [resolvable:$true] %s24_s12 }
   0x4   :  { %s505_s15 = scalar_lea.hbm %s743_s2, 16 }
   0x5   :  { %p506_p0 = scmp.ne.s32.totalorder %s743_s2, %s505_s15  ;;  %p509_p1 = scmp.lt.u32.totalorder %s505_s15, %s743_s2 }
   0x7   :  { %p511_p2 = pnand %p509_p1, %p506_p0 }
   0x9   :  { %514 = shalt.err (!%p511_p2)
}
   0xa   :  { %s515_s20 = scalar_lea.vmem %s38_s10, 16  ;;  %s519_s21 = scalar_lea.vmem %s38_s10, 32 }
   0xb   :  { %p516_p3 = scmp.ne.s32.totalorder %s38_s10, %s515_s20  ;;  %p520_p4 = scmp.lt.s32.totalorder %s38_s10, %s38_s10 }
   0xc   :  { %p521_p5 = scmp.lt.s32.totalorder %s519_s21, %s515_s20 }
   0xe   :  { %p522_p6 = por %p521_p5, %p520_p4 }
  0x10   :  { %p523_p7 = pnand %p522_p6, %p516_p3 }
  0x12   :  { %526 = shalt.err (!%p523_p7)
}
  0x13   :  { %40 = dma.hbm_to_vmem [thread:$0]  %s743_s2, 16, %s38_s10, [#allocation6]  }
  0x14   :  { %s527_s26 = scalar_lea.hbm %s742_s1, 256 }
  0x15   :  { %p528_p8 = scmp.ne.s32.totalorder %s742_s1, %s527_s26  ;;  %p531_p9 = scmp.lt.u32.totalorder %s527_s26, %s742_s1 }
  0x17   :  { %p533_p10 = pnand %p531_p9, %p528_p8 }
  0x19   :  { %536 = shalt.err (!%p533_p10)
}
  0x1a   :  { %s537_s11 = scalar_lea.vmem %s659_s12, 256  ;;  %p542_p12 = scmp.lt.s32.totalorder %s659_s12, %s659_s12 }
  0x1b   :  { %p538_p11 = scmp.ne.s32.totalorder %s659_s12, %s537_s11  ;;  %p543_p13 = scmp.lt.s32.totalorder %s537_s11, %s537_s11 }
  0x1d   :  { %p544_p0 = por %p543_p13, %p542_p12 }
  0x1f   :  { %p545_p1 = pnand %p544_p0, %p538_p11 }
  0x21   :  { %548 = shalt.err (!%p545_p1)
}
  0x22   :  { %s601_s2 = smov 128   ;;  %s602_s10 = smov 8  }
  0x23   :  { %30 = dma.hbm_to_vmem [thread:$0]  %s742_s1, 256, %s659_s12, [#allocation3], %s601_s2, %s601_s2, %s602_s10  }
  0x24   :  { %s603_s15 = smov [#allocation7]   ;;  %s549_s19 = scalar_lea.hbm %s746_s5, 2048 }
  0x25   :  { %s50_s16 = sshll.u32 %s603_s15, 4  ;;  %p550_p2 = scmp.ne.s32.totalorder %s746_s5, %s549_s19  ;;  %s51_s16 = int_to_ptr.vmem [resolvable:$true] %s50_s16 }
  0x26   :  { %p553_p3 = scmp.lt.u32.totalorder %s549_s19, %s746_s5 }
  0x28   :  { %p555_p4 = pnand %p553_p3, %p550_p2 }
  0x2a   :  { %558 = shalt.err (!%p555_p4)
}
  0x2b   :  { %s559_s24 = scalar_lea.vmem %s51_s16, 2048  ;;  %p564_p6 = scmp.lt.s32.totalorder %s51_s16, %s51_s16 }
  0x2c   :  { %p560_p5 = scmp.ne.s32.totalorder %s51_s16, %s559_s24  ;;  %p565_p7 = scmp.lt.s32.totalorder %s559_s24, %s559_s24 }
  0x2e   :  { %p566_p8 = por %p565_p7, %p564_p6 }
  0x30   :  { %p567_p9 = pnand %p566_p8, %p560_p5 }
  0x32   :  { %570 = shalt.err (!%p567_p9)
}
  0x33   :  { %56 = dma.hbm_to_vmem [thread:$0]  %s746_s5, 2048, %s51_s16, [#allocation6], %s601_s2, %s601_s2, %s602_s10  }
  0x34   :  { %593 = dma.done.wait [#allocation3], 256  }
  0x35   :  { %594 = vsyncadd [#allocation3], 4294967040 }
  0x36   :  { %595 = dma.done.wait [#allocation6], 2064  }
  0x37   :  { %596 = vsyncadd [#allocation6], 4294965232  ;;  %v604_v0 = vmov 0.0|0.0   ;;  %vm605_vm0 = vmmov 0   ;;  %v606_v1 = vmov 0.0   ;;  %v73_v2 = vld [vmem:[#allocation2] sm:$0xff] }
  0x38   :  { %456 = vmatprep.subr.bf16.mxu0 %v604_v0  ;;  %413 = vmatprep.mubr.msk.f32.mxu0 %vm605_vm0, %v606_v1  ;;  %v74_v3 = vld [vmem:[#allocation2 + $0x8] sm:$0xff]  ;;  %v72_v5 = vld [vmem:[%s741_s0] sm:$0xff]  ;;  %vm82_vm1 = vcmask 130048   ;;  %v382_v6 = vld [vmem:[#allocation5] ss:$0 sm:$0xff]  ;;  %v607_v54 = vmov 0  }
  0x39   :  { %459 = vmatprep.subr.bf16.mxu1 %v604_v0  ;;  %448 = vmatprep.mubr.msk.f32.mxu1 %vm605_vm0, %v606_v1  ;;  %v457_v4 = vpack.c.bf16 %v74_v3, %v73_v2  ;;  %v192_v14 = vld [vmem:[#allocation7] sm:$0xff]  ;;  %v193_v15 = vld [vmem:[#allocation7 + $0x8] sm:$0xff]  ;;  %v194_v17 = vld [vmem:[#allocation7 + $0x10] sm:$0xff]  ;;  %vm364_vm4 = vcmask 64512  }
  0x3a   :  { %v460_v16 = vpack.c.bf16 %v193_v15, %v192_v14  ;;  %v195_v18 = vld [vmem:[#allocation7 + $0x18] sm:$0xff]  ;;  %v196_v20 = vld [vmem:[#allocation7 + $0x20] sm:$0xff]  ;;  %v197_v21 = vld [vmem:[#allocation7 + $0x28] sm:$0xff]  ;;  %493 = vset.pattern.permute.xlu1 %v607_v54  ;;  %494 = vset.pattern.permute.xlu0 %v607_v54 }
  0x3b   :  { %458 = vmatpush3.bf16.msra.mxu0 %v457_v4  ;;  %v463_v19 = vpack.c.bf16 %v195_v18, %v194_v17  ;;  %v198_v22 = vld [vmem:[#allocation7 + $0x30] sm:$0xff]  ;;  %v466_v23 = vpack.c.bf16 %v197_v21, %v196_v20  ;;  %v199_v24 = vld [vmem:[#allocation7 + $0x38] sm:$0xff]  ;;  %v200_v26 = vld [vmem:[#allocation7 + $0x40] sm:$0xff] }
  0x3c   :  { %451 = vmatprep.subr.mxu0 %v606_v1  ;;  %461 = vmatpush3.bf16.msra.mxu1 %v460_v16  ;;  %v469_v25 = vpack.c.bf16 %v199_v24, %v198_v22  ;;  %v201_v27 = vld [vmem:[#allocation7 + $0x48] sm:$0xff]  ;;  %v202_v29 = vld [vmem:[#allocation7 + $0x50] sm:$0xff]  ;;  %v203_v30 = vld [vmem:[#allocation7 + $0x58] sm:$0xff] }
  0x3d   :  { %462 = vmatprep.subr.bf16.mxu1 %v604_v0  ;;  %v472_v28 = vpack.c.bf16 %v201_v27, %v200_v26  ;;  %v475_v31 = vpack.c.bf16 %v203_v30, %v202_v29  ;;  %v204_v32 = vld [vmem:[#allocation7 + $0x60] sm:$0xff]  ;;  %v205_v33 = vld [vmem:[#allocation7 + $0x68] sm:$0xff]  ;;  %v206_v35 = vld [vmem:[#allocation7 + $0x70] sm:$0xff] }
  0x3e   :  { %414 = vmatmul.mubr.msk.f32.vlgmr.msra.gmra.mrb[0].mxu0 %vm82_vm1, %v72_v5  ;;  %v478_v34 = vpack.c.bf16 %v205_v33, %v204_v32  ;;  %v207_v36 = vld [vmem:[#allocation7 + $0x78] sm:$0xff]  ;;  %v384_v46 = vld [vmem:[%s744_s3] ss:$0 sm:$0xff] }
  0x3f   :  { %453 = vmatprep.mubr.msk.f32.mxu0 %vm605_vm0, %v606_v1  ;;  %v481_v37 = vpack.c.bf16 %v207_v36, %v206_v35  ;;  %v385_v49 = vld [vmem:[%s745_s4] ss:$0 sm:$0xff] }
  0x40   :  { %464 = vmatpush3.bf16.msra.mxu1 %v463_v19  ;;  %v287_v53 = vld [vmem:[%s749_s8] sm:$0xff]  ;;  %s608_s8 = smov [#allocation8]  }
  0x41   :  { %465 = vmatprep.subr.bf16.mxu1 %v604_v0  ;;  %290 = vperm.xlu1 %493, %v287_v53   ;;  %v386_v55 = vld [vmem:[%s747_s6] ss:$0 sm:$0xff]  ;;  %s372_s10 = sshll.u32 %s608_s8, 4  ;;  %s373_s10 = int_to_ptr.vmem [resolvable:$true] %s372_s10 }
  0x42   :  { %v286_v60 = vld [vmem:[%s748_s7] sm:$0xff]  ;;  %s571_s6 = scalar_lea.vmem %s373_s10, 128  ;;  %p576_p11 = scmp.lt.s32.totalorder %s373_s10, %s373_s10 }
  0x43   :  { %p572_p10 = scmp.ne.s32.totalorder %s373_s10, %s571_s6  ;;  %p577_p12 = scmp.lt.s32.totalorder %s571_s6, %s571_s6 }
  0x44   :  { %467 = vmatpush3.bf16.msra.mxu1 %v466_v23 }
  0x45   :  { %468 = vmatprep.subr.bf16.mxu1 %v604_v0  ;;  %p578_p13 = por %p577_p12, %p576_p11 }
  0x47   :  { %p579_p0 = pnand %p578_p13, %p572_p10 }
  0x48   :  { %470 = vmatpush3.bf16.msra.mxu1 %v469_v25 }
  0x49   :  { %471 = vmatprep.subr.bf16.mxu1 %v604_v0 }
  0x4c   :  { %473 = vmatpush3.bf16.msra.mxu1 %v472_v28 }
  0x4d   :  { %474 = vmatprep.subr.bf16.mxu1 %v604_v0 }
  0x50   :  { %476 = vmatpush3.bf16.msra.mxu1 %v475_v31 }
  0x51   :  { %477 = vmatprep.subr.bf16.mxu1 %v604_v0 }
  0x54   :  { %479 = vmatpush3.bf16.msra.mxu1 %v478_v34 }
  0x55   :  { %480 = vmatprep.subr.bf16.mxu1 %v604_v0 }
  0x58   :  { %482 = vmatpush3.bf16.msra.mxu1 %v481_v37 }
  0xc0   :  { %v291_v61 = vpop.permute.xlu1 %290 }
 0x111   :  { %v152_v7 = vpop.f32.mrb[0].mxu0 }
 0x112   :  { %v153_v8 = vadd.f32 %v382_v6, %v152_v7  ;;  %v415_v9 = vpop.f32.mrb[1].mxu0 }
 0x114   :  { %156 = vadd.xlane.f32.xlu0 %v153_v8 }
 0x1a1   :  { %v157_v10 = vpop.xlane.xlu0 %156 }
 0x1a2   :  { %v159_v11 = vmul.f32 0.0078125, %v157_v10 }
 0x1a4   :  { %v160_v12 = vsub.f32 %v153_v8, %v159_v11 }
 0x1a6   :  { %v161_v13 = vmul.f32 %v160_v12, %v160_v12  ;;  %v181_v47 = vmul.f32 %v384_v46, %v160_v12 }
 0x1a8   :  { %162 = vadd.xlane.f32.xlu0 %v161_v13 }
 0x235   :  { %v163_v38 = vpop.xlane.xlu0 %162 }
 0x236   :  { %v164_v39 = vmul.f32 0.007874016, %v163_v38 }
 0x238   :  { %495 = vrsqrt.f32 %v164_v39  ;;  %vm167_vm2 = vcmp.eq.f32.partialorder %v164_v39, inf  ;;  %v170_v42 = vand.u32 2147483648, %v164_v39  ;;  %vm169_vm3 = vcmp.eq.f32.partialorder %v164_v39, 0.0 }
 0x242   :  { %v496_v40 = vpop.eup %495 }
 0x243   :  { %v166_v41 = vmul.f32 %v496_v40, %v164_v39 }
 0x245   :  { %v168_v43 = vsel %vm167_vm2, %v164_v39, %v166_v41 }
 0x246   :  { %v171_v44 = vsel %vm169_vm3, %v170_v42, %v168_v43 }
 0x247   :  { %v172_v45 = vadd.f32 1e-06, %v171_v44 }
 0x249   :  { %497 = vrcp.f32 %v172_v45 }
 0x253   :  { %v498_v48 = vpop.eup %497 }
 0x254   :  { %v182_v50 = vmul.f32 %v498_v48, %v181_v47 }
 0x256   :  { %v190_v51 = vadd.f32 %v385_v49, %v182_v50 }
 0x258   :  { %499 = vtanh.f32 %v190_v51 }
 0x262   :  { %v500_v52 = vpop.eup %499 }
 0x263   :  { %449 = vmatmul.mubr.f32.vlgmr.msra.gmra.mrb[0].mxu1 %v500_v52 }
 0x336   :  { %v281_v56 = vpop.f32.mrb[0].mxu1 }
 0x337   :  { %v282_v57 = vadd.f32 %v386_v55, %v281_v56  ;;  %v450_v58 = vpop.f32.mrb[1].mxu1 }
 0x339   :  { %501 = vtanh.f32 %v282_v57 }
 0x343   :  { %v502_v59 = vpop.eup %501 }
 0x344   :  { %452 = vmatpush3.xpose.msra.mxu0 %v502_v59 }
 0x347   :  { %454 = vmatmul.mubr.f32.vlgmr.msra.gmra.mrb[2].mxu0 %v286_v60 }
 0x41a   :  { %v359_v62 = vpop.f32.mrb[2].mxu0 }
 0x41b   :  { %v360_v63 = vadd.f32 %v359_v62, %v291_v61  ;;  %v455_v0 = vpop.f32.mrb[3].mxu0 }
 0x41d   :  { %503 = vtanh.f32 %v360_v63 }
 0x427   :  { %v504_v1 = vpop.eup %503 }
 0x428   :  { %365 = vst.msk [vmem:[#allocation8] sm:$0xff] %vm364_vm4, %v504_v1 }
 0x429   :  { %582 = shalt.err (!%p579_p0)
}
 0x42a   :  { %s583_s14 = scalar_lea.hbm %s750_s9, 128 }
 0x42b   :  { %p584_p1 = scmp.ne.s32.totalorder %s750_s9, %s583_s14  ;;  %p587_p2 = scmp.lt.u32.totalorder %s583_s14, %s750_s9 }
 0x42d   :  { %p589_p3 = pnand %p587_p2, %p584_p1 }
 0x42f   :  { %592 = shalt.err (!%p589_p3)
}
 0x430   :  { %375 = dma.vmem_to_hbm [thread:$0]  %s373_s10, 128, %s750_s9, [#allocation4]  }
 0x431   :  { %597 = dma.done.wait [#allocation4], 128  }
 0x432   :  { %598 = vsyncadd [#allocation4], 4294967168 }
 0x433   :  { %379 = vsyncpa [#allocation3], 1 }
 0x434   :  { %380 = vsyncpa [#allocation6], 1 }
 0x435   :  { %381 = vsyncpa [#allocation4], 1 }

</bundles_post_ra>
